<compile_context>
chip_gen: v7x
topology: tpu7x:2x2x1
jax: 0.10.0
libtpu: 0.0.40
codegen_flags: <defaults>
</compile_context>

<pallas_src>
import jax
import jax.numpy as jnp
from jax import lax
from jax.experimental import pallas as pl
from jax.experimental.pallas import tpu as pltpu

_LANES = 128
_SUBLANES = 8
_VREG = _SUBLANES * _LANES  # 1024


def binary_dice_loss(inputs, targets, *, vmem_budget_bytes=24 << 20):
    """Pallas implementation of BinaryDiceLoss.forward (any N,...) inputs."""
    assert inputs.shape == targets.shape
    N = targets.shape[0]

    # ---- wrapper-side layout glue (equivalent of .view(N, -1)) ------------
    x = inputs.reshape(N, -1)
    t = targets.reshape(N, -1)
    D = x.shape[1]

    # Zero-pad D to a multiple of 8*128: full vregs and an 8-row-aligned
    # reduction axis.  Zeros contribute nothing to sum(x*t) / sum(x) / sum(t).
    if D % _VREG != 0:
        pad = _VREG - D % _VREG
        x = jnp.pad(x, ((0, 0), (0, pad)))
        t = jnp.pad(t, ((0, 0), (0, pad)))
        D += pad
    R = D // _LANES                       # rows of 128 lanes; multiple of 8
    x3 = x.reshape(N, R, _LANES)
    t3 = t.reshape(N, R, _LANES)

    # ---- tile size: biggest per-sample block that fits the VMEM budget ----
    itemsize = x3.dtype.itemsize
    # double-buffered working set = 2 operands * 2 buffers * TR * 128 * itemsize
    tr_budget = vmem_budget_bytes // (4 * _LANES * itemsize)
    tr_budget = max(_SUBLANES, (tr_budget // _SUBLANES) * _SUBLANES)
    TR = min(R, tr_budget)
    n_tiles = pl.cdiv(R, TR)
    full_chunks = TR // _SUBLANES
    tail_rows = R - (n_tiles - 1) * TR    # multiple of 8
    tail_chunks = tail_rows // _SUBLANES if tail_rows != TR else None

    working_set = 4 * TR * _LANES * itemsize
    vmem_limit = int(min(working_set + (16 << 20), 64 << 20))

    def kernel(x_ref, t_ref, inter_ref, sums_ref):
        d = pl.program_id(1)

        @pl.when(d == 0)
        def _init():
            inter_ref[...] = jnp.zeros_like(inter_ref)
            sums_ref[...] = jnp.zeros_like(sums_ref)

        def fold(n_chunks):
            def body(c, carry):
                r0 = pl.multiple_of(c * _SUBLANES, _SUBLANES)
                xb = x_ref[pl.ds(r0, _SUBLANES), :].astype(jnp.float32)
                tb = t_ref[pl.ds(r0, _SUBLANES), :].astype(jnp.float32)
                inter_ref[...] += xb * tb       # intersection partials
                sums_ref[...] += xb + tb        # sum(x) + sum(t) fused
                return carry
            lax.fori_loop(0, n_chunks, body, 0,
                          unroll=max(1, min(8, n_chunks)))

        if tail_chunks is None:
            fold(full_chunks)
        else:
            nd = pl.num_programs(1)

            @pl.when(d < nd - 1)
            def _full():
                fold(full_chunks)

            @pl.when(d == nd - 1)
            def _tail():
                fold(tail_chunks)       # static shorter count; no masking

    inter, sums = pl.pallas_call(
        kernel,
        out_shape=(
            jax.ShapeDtypeStruct((N, _SUBLANES, _LANES), jnp.float32),
            jax.ShapeDtypeStruct((N, _SUBLANES, _LANES), jnp.float32),
        ),
        grid=(N, n_tiles),
        in_specs=[
            pl.BlockSpec((None, TR, _LANES), lambda n, d: (n, d, 0)),
            pl.BlockSpec((None, TR, _LANES), lambda n, d: (n, d, 0)),
        ],
        out_specs=[
            pl.BlockSpec((None, _SUBLANES, _LANES), lambda n, d: (n, 0, 0)),
            pl.BlockSpec((None, _SUBLANES, _LANES), lambda n, d: (n, 0, 0)),
        ],
        compiler_params=pltpu.CompilerParams(
            dimension_semantics=("parallel", "arbitrary"),
            vmem_limit_bytes=vmem_limit),
    )(x3, t3)

    # Tiny per-sample finish in the wrapper (keeps the kernel free of XLU
    # reduces and scalar writes, and keeps the output lane-dense).
    smooth = jnp.float32(1.0)
    inter_s = jnp.sum(inter, axis=(1, 2))
    sums_s = jnp.sum(sums, axis=(1, 2))
    dice = (2.0 * inter_s + smooth) / (sums_s + smooth)
    return jnp.float32(1.0) - jnp.sum(dice) / jnp.float32(N)


def _reference(inputs, targets):
    # Pure-JAX reference mirroring the PyTorch forward exactly.
    N = targets.shape[0]
    smooth = 1.0
    x = inputs.reshape(N, -1).astype(jnp.float32)
    t = targets.reshape(N, -1).astype(jnp.float32)
    inter = jnp.sum(x * t, axis=1)
    dice = (2.0 * inter + smooth) / (jnp.sum(x, axis=1) + jnp.sum(t, axis=1) + smooth)
    return 1.0 - jnp.sum(dice) / N


if __name__ == "__main__":
    key = jax.random.PRNGKey(0)
    k1, k2, k3, k4 = jax.random.split(key, 4)

    # Case 1: NCHW = (2, 4, 16, 16) => D = 1024 (already vreg-aligned,
    # single tile per sample, grid (2, 1)).
    x = jax.nn.sigmoid(jax.random.normal(k1, (2, 4, 16, 16), dtype=jnp.float32))
    y = (jax.random.uniform(k2, (2, 4, 16, 16)) > 0.5).astype(jnp.float32)
    loss = binary_dice_loss(x, y)
    jax.block_until_ready(loss)
    ref = _reference(x, y)
    assert jnp.allclose(loss, ref, atol=1e-5, rtol=1e-5), (loss, ref)

    # Case 2: ragged D = 2304 (needs zero padding) with a tiny VMEM budget to
    # force multiple reduction tiles + a ragged tail block.
    x2 = jax.nn.sigmoid(jax.random.normal(k3, (2, 4, 24, 24), dtype=jnp.float32))
    y2 = (jax.random.uniform(k4, (2, 4, 24, 24)) > 0.5).astype(jnp.float32)
    loss2 = binary_dice_loss(x2, y2, vmem_budget_bytes=4 * _LANES * 4 * 16)
    jax.block_until_ready(loss2)
    ref2 = _reference(x2, y2)
    assert jnp.allclose(loss2, ref2, atol=1e-5, rtol=1e-5), (loss2, ref2)

    print("KERNEL_OK")
</pallas_src>

<mosaic_0001>
module attributes {stable_mosaic.version = 11 : i64} {
  func.func @kernel(%arg0: i32, %arg1: i32, %arg2: memref<1x8x128xf32, #tpu.memory_space<vmem>>, %arg3: memref<1x8x128xf32, #tpu.memory_space<vmem>>, %arg4: memref<1x8x128xf32, #tpu.memory_space<vmem>>, %arg5: memref<1x8x128xf32, #tpu.memory_space<vmem>>) attributes {dimension_semantics = [#tpu.dimension_semantics<parallel>, #tpu.dimension_semantics<arbitrary>], iteration_bounds = array<i64: 2, 1>, scalar_prefetch = 0 : i64, scratch_operands = 0 : i64, tpu.core_type = #tpu.core_type<tc>, window_params = [{transform_indices = @transform_0, window_bounds = array<i64: 1, 8, 128>}, {transform_indices = @transform_1, window_bounds = array<i64: 1, 8, 128>}, {transform_indices = @transform_2, window_bounds = array<i64: 1, 8, 128>}, {transform_indices = @transform_3, window_bounds = array<i64: 1, 8, 128>}]} {
    %c0_i32 = arith.constant 0 : i32
    %0 = arith.cmpi eq, %arg1, %c0_i32 : i32
    %1 = arith.extui %0 : i1 to i32
    %c0_i32_0 = arith.constant 0 : i32
    %2 = arith.cmpi ne, %1, %c0_i32_0 : i32
    scf.if %2 {
      %cst = arith.constant 0.000000e+00 : f32
      %25 = vector.broadcast %cst : f32 to vector<8x128xf32>
      %c0_17 = arith.constant 0 : index
      %c0_18 = arith.constant 0 : index
      %c0_19 = arith.constant 0 : index
      %26 = vector.load %arg4[%c0_17, %c0_18, %c0_19] : memref<1x8x128xf32, #tpu.memory_space<vmem>>, vector<1x8x128xf32>
      %27 = vector.shape_cast %26 : vector<1x8x128xf32> to vector<8x128xf32>
      %28 = vector.shape_cast %25 : vector<8x128xf32> to vector<1x8x128xf32>
      tpu.vector_store %arg4[%c0_17, %c0_18, %c0_19], %28 {strides = array<i32>} : memref<1x8x128xf32, #tpu.memory_space<vmem>>, vector<1x8x128xf32>,
      %cst_20 = arith.constant 0.000000e+00 : f32
      %29 = vector.broadcast %cst_20 : f32 to vector<8x128xf32>
      %c0_21 = arith.constant 0 : index
      %c0_22 = arith.constant 0 : index
      %c0_23 = arith.constant 0 : index
      %30 = vector.load %arg5[%c0_21, %c0_22, %c0_23] : memref<1x8x128xf32, #tpu.memory_space<vmem>>, vector<1x8x128xf32>
      %31 = vector.shape_cast %30 : vector<1x8x128xf32> to vector<8x128xf32>
      %32 = vector.shape_cast %29 : vector<8x128xf32> to vector<1x8x128xf32>
      tpu.vector_store %arg5[%c0_21, %c0_22, %c0_23], %32 {strides = array<i32>} : memref<1x8x128xf32, #tpu.memory_space<vmem>>, vector<1x8x128xf32>,
    } else {
    }
    %c0_i32_1 = arith.constant 0 : i32
    %c8_i32 = arith.constant 8 : i32
    %3 = arith.muli %c0_i32_1, %c8_i32 : i32
    %4 = tpu.assume_multiple %3, 8 : i32
    %c0 = arith.constant 0 : index
    %5 = arith.index_cast %4 : i32 to index
    %c0_2 = arith.constant 0 : index
    %6 = vector.load %arg2[%c0, %5, %c0_2] : memref<1x8x128xf32, #tpu.memory_space<vmem>>, vector<1x8x128xf32>
    %7 = vector.shape_cast %6 : vector<1x8x128xf32> to vector<8x128xf32>
    %c0_3 = arith.constant 0 : index
    %8 = arith.index_cast %4 : i32 to index
    %c0_4 = arith.constant 0 : index
    %9 = vector.load %arg3[%c0_3, %8, %c0_4] : memref<1x8x128xf32, #tpu.memory_space<vmem>>, vector<1x8x128xf32>
    %10 = vector.shape_cast %9 : vector<1x8x128xf32> to vector<8x128xf32>
    %c0_5 = arith.constant 0 : index
    %c0_6 = arith.constant 0 : index
    %c0_7 = arith.constant 0 : index
    %11 = vector.load %arg4[%c0_5, %c0_6, %c0_7] : memref<1x8x128xf32, #tpu.memory_space<vmem>>, vector<1x8x128xf32>
    %12 = vector.shape_cast %11 : vector<1x8x128xf32> to vector<8x128xf32>
    %13 = arith.mulf %7, %10 : vector<8x128xf32>
    %14 = arith.addf %12, %13 : vector<8x128xf32>
    %c0_8 = arith.constant 0 : index
    %c0_9 = arith.constant 0 : index
    %c0_10 = arith.constant 0 : index
    %15 = vector.load %arg4[%c0_8, %c0_9, %c0_10] : memref<1x8x128xf32, #tpu.memory_space<vmem>>, vector<1x8x128xf32>
    %16 = vector.shape_cast %15 : vector<1x8x128xf32> to vector<8x128xf32>
    %17 = vector.shape_cast %14 : vector<8x128xf32> to vector<1x8x128xf32>
    tpu.vector_store %arg4[%c0_8, %c0_9, %c0_10], %17 {strides = array<i32>} : memref<1x8x128xf32, #tpu.memory_space<vmem>>, vector<1x8x128xf32>,
    %c0_11 = arith.constant 0 : index
    %c0_12 = arith.constant 0 : index
    %c0_13 = arith.constant 0 : index
    %18 = vector.load %arg5[%c0_11, %c0_12, %c0_13] : memref<1x8x128xf32, #tpu.memory_space<vmem>>, vector<1x8x128xf32>
    %19 = vector.shape_cast %18 : vector<1x8x128xf32> to vector<8x128xf32>
    %20 = arith.addf %7, %10 : vector<8x128xf32>
    %21 = arith.addf %19, %20 : vector<8x128xf32>
    %c0_14 = arith.constant 0 : index
    %c0_15 = arith.constant 0 : index
    %c0_16 = arith.constant 0 : index
    %22 = vector.load %arg5[%c0_14, %c0_15, %c0_16] : memref<1x8x128xf32, #tpu.memory_space<vmem>>, vector<1x8x128xf32>
    %23 = vector.shape_cast %22 : vector<1x8x128xf32> to vector<8x128xf32>
    %24 = vector.shape_cast %21 : vector<8x128xf32> to vector<1x8x128xf32>
    tpu.vector_store %arg5[%c0_14, %c0_15, %c0_16], %24 {strides = array<i32>} : memref<1x8x128xf32, #tpu.memory_space<vmem>>, vector<1x8x128xf32>,
    %c1_i32 = arith.constant 1 : i32
    return
  }
  func.func @transform_0(%arg0: i32, %arg1: i32) -> (i32, i32, i32) {
    %c0_i32 = arith.constant 0 : i32
    %c0_i32_0 = arith.constant 0 : i32
    return %arg0, %arg1, %c0_i32 : i32, i32, i32
  }
  func.func @transform_1(%arg0: i32, %arg1: i32) -> (i32, i32, i32) {
    %c0_i32 = arith.constant 0 : i32
    %c0_i32_0 = arith.constant 0 : i32
    return %arg0, %arg1, %c0_i32 : i32, i32, i32
  }
  func.func @transform_2(%arg0: i32, %arg1: i32) -> (i32, i32, i32) {
    %c0_i32 = arith.constant 0 : i32
    %c0_i32_0 = arith.constant 0 : i32
    %c0_i32_1 = arith.constant 0 : i32
    return %arg0, %c0_i32, %c0_i32_0 : i32, i32, i32
  }
  func.func @transform_3(%arg0: i32, %arg1: i32) -> (i32, i32, i32) {
    %c0_i32 = arith.constant 0 : i32
    %c0_i32_0 = arith.constant 0 : i32
    %c0_i32_1 = arith.constant 0 : i32
    return %arg0, %c0_i32, %c0_i32_0 : i32, i32, i32
  }
}

</mosaic_0001>

<bundles_post_ra>
// kernel: tpu_custom_call.1
= control target key start
LH: loop header
LB: loop body
LE: loop exit
PB: predicated region body
PF: predicated region fallthrough
CT: control target
= control target key end

     0   :  { %9 = vsyncpa [#allocation3], 0  ;;  %s980_s0 = inlined_call_operand.hbm [shape: f32[2,8,128], index: 0, kind: input, shape index: {}]   ;;  %s981_s1 = inlined_call_operand.hbm [shape: f32[2,8,128], index: 1, kind: input, shape index: {}]   ;;  %s982_s2 = inlined_call_operand.hbm [shape: f32[2,8,128], index: 2, kind: output, shape index: {0}]   ;;  %s983_s3 = inlined_call_operand.hbm [shape: f32[2,8,128], index: 3, kind: output, shape index: {1}]  }
   0x1   :  { %11 = vsyncpa [#allocation3 + $0x1], 0 }
   0x2   :  { %12 = vsyncpa [#allocation6], 0 }
   0x3   :  { %14 = vsyncpa [#allocation6 + $0x1], 0 }
   0x4   :  { %15 = vsyncpa [#allocation4], 0 }
   0x5   :  { %17 = vsyncpa [#allocation4 + $0x1], 0 }
   0x6   :  { %18 = vsyncpa [#allocation9], 0 }
   0x7   :  { %20 = vsyncpa [#allocation9 + $0x1], 0  ;;  %s731_s12 = smov 0   ;;  %s733_s13 = smov 0  }
   0x8   :  { %s735_s14 = smov 0   ;;  %s737_s15 = smov 0  }
   0x9   :  { %s739_s16 = smov 0   ;;  %s741_s17 = smov 0  }
   0xa LB: > { %s435_s18 = sadd.s32 4294967295, %s705_s17   ;;  %s436_s19 = sadd.s32 4294967294, %s705_s17   ;;  %s705_s17 = sphi %s741_s17, %s26_s17   ;;  %s701_s16 = sphi %s739_s16, %s1003_s16   ;;  %s697_s15 = sphi %s737_s15, %s1002_s15   ;;  %s693_s14 = sphi %s735_s14, %s1001_s14   ;;  %s689_s13 = sphi %s733_s13, %s1000_s13   ;;  %s685_s12 = sphi %s731_s12, %s999_s12  }
   0xb   : > { %s38_s20 = sadd.s32 1, %s701_s16  ;;  %s47_s21 = sadd.s32 1, %s693_s14 }
   0xc   : > { %p40_p0 = scmp.ge.s32.totalorder %s38_s20, 2  ;;  %p54_p1 = scmp.ne.s32.totalorder %s693_s14, %s689_s13 }
   0xd   : > { %p55_p2 = scmp.eq.s32.totalorder %s705_s17, 0  ;;  %p60_p3 = scmp.ne.s32.totalorder %s689_s13, %s685_s12 }
   0xe   : > { %s1005_s20 = smov (%p40_p0, %s38_s20), 0  ;;  %p61_p5 = scmp.eq.s32.totalorder %s435_s18, 0 }
   0xf   : > { %p772_p4 = por %p55_p2, %p54_p1  ;;  %s42_s23 = ssub.s32 %s701_s16, %s1005_s20 }
  0x10   : > { %p112_p6 = scmp.eq.s32.totalorder %s435_s18, 1  ;;  %p45_p7 = scmp.eq.s32.totalorder %s42_s23, 0 }
  0x11   : > { %p778_p8 = por %p61_p5, %p60_p3  ;;  %p118_p10 = scmp.eq.s32.totalorder %s436_s19, 1 }
  0x12   : > { %p782_p9 = por %p112_p6, %p54_p1  ;;  %p476_p13 = scmp.lt.s32.totalorder %s705_s17, 2 }
  0x13   : > { %s987_s24 = scalar_select %p778_p8, 1, 0 }
  0x14   : > { %s988_s25 = scalar_select %p782_p9, 1, 0 }
  0x15   : > { %s787_s26 = scalar_select %p45_p7, %s693_s14, %s47_s21  }
  0x16   : > { %p789_p11 = por %p118_p10, %p60_p3  ;;  %s796_s28 = sand.u32 1, %s693_s14  }
  0x17   : > { %s439_s29 = sshll.u32 %s796_s28, 3  ;;  %s440_s30 = sshll.u32 %s701_s16, 7 }
  0x18   : > { %s989_s27 = scalar_select %p789_p11, 1, 0 }
  0x19   : > { %s805_s6 = scalar_lea.hbm %s980_s0, %s440_s30  ;;  %s168_s7 = scalar_lea.vmem [#allocation2], %s439_s29 }
  0x1a   : > { %s176_s8 = sshll.u32 %s168_s7, 4  ;;  %p813_p0 = pnand %p476_p13, %p772_p4  ;;  %s809_s8 = int_to_ptr.vmem [resolvable:$true] %s176_s8 }
  0x1b   : > { %s165_s10 = scalar_lea.sflag [#allocation3], %s796_s28  ;;  %s527_s11 = scalar_lea.hbm %s805_s6, 128 }
  0x1c   : > { %p528_p3 = scmp.ne.s32.totalorder %s805_s6, %s527_s11  ;;  %p529_p5 = pneg %p813_p0 }
  0x1d   : > { %s532_s21 = scalar_lea.hbm %s980_s0, 256  ;;  %p533_p4 = scmp.lt.u32.totalorder %s805_s6, %s980_s0 }
  0x1e   : > { %p530_p6 = pnand %p529_p5, %p528_p3  ;;  %p534_p10 = scmp.lt.u32.totalorder %s532_s21, %s527_s11 }
  0x1f   : > { %p536_p12 = scmp.lt.u32.totalorder %s527_s11, %s805_s6 }
  0x20   : > { %p531_p7 = pneg %p530_p6  ;;  %p535_p13 = por %p534_p10, %p533_p4 }
  0x22   : > { %p537_p1 = por %p536_p12, %p535_p13 }
  0x24   : > { %p538_p2 = pnand %p537_p1, %p531_p7 }
  0x26   : > { %541 = shalt.err (!%p538_p2)
}
  0x27   : > { %s542_s4 = scalar_lea.vmem %s809_s8, 128  ;;  %s707_s5 = smov [#allocation2]  }
  0x28   : > { %p543_p3 = scmp.ne.s32.totalorder %s809_s8, %s542_s4  ;;  %s547_s7 = sshll.u32 %s707_s5, 4  ;;  %s548_s7 = int_to_ptr.vmem [resolvable:$false] %s547_s7 }
  0x29   : > { %s549_s18 = scalar_lea.vmem %s548_s7, 256  ;;  %p550_p9 = scmp.lt.s32.totalorder %s809_s8, %s548_s7 }
  0x2a   : > { %p545_p6 = pnand %p543_p3, %p529_p5  ;;  %p551_p4 = scmp.lt.s32.totalorder %s549_s18, %s542_s4 }
  0x2c   : > { %p546_p11 = pneg %p545_p6  ;;  %p552_p10 = por %p551_p4, %p550_p9 }
  0x2e   : > { %p553_p12 = pnand %p552_p10, %p546_p11 }
  0x30   : > { %556 = shalt.err (!%p553_p12)
}
  0x31   : > { %465 = dma.hbm_to_vmem [thread:$0]  (!%p813_p0), %s805_s6, 128, %s809_s8, %s165_s10  }
  0x32   : > { %p991_p1 = scmp.lt.s32.totalorder %s705_s17, 3  ;;  %p992_p2 = scmp.ge.s32.totalorder %s705_s17, 1 }
  0x33   : > { %s858_s22 = scalar_lea.hbm %s981_s1, %s440_s30  ;;  %s187_s23 = scalar_lea.vmem [#allocation5], %s439_s29 }
  0x34   : > { %p849_p7 = pnand %p992_p2, %p991_p1  ;;  %s195_s4 = sshll.u32 %s187_s23, 4  ;;  %s196_s4 = int_to_ptr.vmem [resolvable:$true] %s195_s4 }
  0x35   : > { %s184_s6 = scalar_lea.sflag [#allocation6], %s796_s28  ;;  %s557_s8 = scalar_lea.hbm %s858_s22, 128 }
  0x36   : > { %s993_s11 = scalar_select %p849_p7, 1, 0 }
  0x37   : > { %p558_p9 = scmp.ne.s32.totalorder %s858_s22, %s557_s8  ;;  %s562_s30 = scalar_lea.hbm %s981_s1, 256 }
  0x38   : > { %p563_p3 = scmp.lt.u32.totalorder %s858_s22, %s981_s1  ;;  %p564_p6 = scmp.lt.u32.totalorder %s562_s30, %s557_s8 }
  0x39   : > { %p560_p11 = pnand %p558_p9, %p529_p5  ;;  %p566_p10 = scmp.lt.u32.totalorder %s557_s8, %s858_s22 }
  0x3a   : > { %p565_p4 = por %p564_p6, %p563_p3 }
  0x3b   : > { %p561_p13 = pneg %p560_p11 }
  0x3c   : > { %p567_p12 = por %p566_p10, %p565_p4 }
  0x3e   : > { %p568_p1 = pnand %p567_p12, %p561_p13 }
  0x40   : > { %571 = shalt.err (!%p568_p1)
}
  0x41   : > { %s572_s28 = scalar_lea.vmem %s196_s4, 128  ;;  %s708_s29 = smov [#allocation5]  }
  0x42   : > { %p573_p2 = scmp.ne.s32.totalorder %s196_s4, %s572_s28  ;;  %s577_s19 = sshll.u32 %s708_s29, 4  ;;  %s578_s19 = int_to_ptr.vmem [resolvable:$false] %s577_s19 }
  0x43   : > { %s579_s21 = scalar_lea.vmem %s578_s19, 256  ;;  %p580_p8 = scmp.lt.s32.totalorder %s196_s4, %s578_s19 }
  0x44   : > { %p575_p9 = pnand %p573_p2, %p529_p5  ;;  %p581_p7 = scmp.lt.s32.totalorder %s579_s21, %s572_s28 }
  0x46   : > { %p576_p11 = pneg %p575_p9  ;;  %p582_p3 = por %p581_p7, %p580_p8 }
  0x48   : > { %p583_p6 = pnand %p582_p3, %p576_p11 }
  0x4a   : > { %586 = shalt.err (!%p583_p6)
}
  0x4b   : > { %468 = dma.hbm_to_vmem [thread:$0]  (!%p813_p0), %s858_s22, 128, %s196_s4, %s184_s6  }
  0x4c   : > { %p994_p13 = scmp.ne.s32.totalorder %s993_s11, 0 }
  0x4d   : > { %s885_s23 = sand.u32 (!%p994_p13), 1, %s689_s13   ;;  %p995_p5 = scmp.ne.s32.totalorder (!%p994_p13), %s987_s24, 0 }
  0x4e   : > { %204 = sbr.rel (%p994_p13) target bundleno = 138 (0x8a), region = 28  ;;  %s444_s8 = sshll.u32 (!%p994_p13), %s885_s23, 3 }
  0x4f   : > { %s207_s10 = scalar_lea.sflag (!%p994_p13), [#allocation3], %s885_s23  ;;  %s210_s5 = scalar_lea.vmem (!%p994_p13), [#allocation2], %s444_s8 }
  0x55   : > { %668 = dma.done.wait (%p995_p5), %s207_s10, 128  }
  0x56   : > { %670 = vsyncadd (%p995_p5), %s207_s10, 4294967168  ;;  %s216_s9 = scalar_lea.sflag [#allocation6], %s885_s23  ;;  %s219_s22 = scalar_lea.vmem [#allocation5], %s444_s8 }
  0x57   : > { %672 = dma.done.wait (%p995_p5), %s216_s9, 128  }
  0x58   : > { %674 = vsyncadd (%p995_p5), %s216_s9, 4294967168  ;;  %s450_s11 = sshll.u32 %s697_s15, 7  ;;  %v258_v0 = vld [vmem:[%s210_s5] sm:$0xff]  ;;  %v259_v1 = vld [vmem:[%s219_s22] sm:$0xff]  ;;  %s244_s4 = scalar_lea.vmem [#allocation7], %s444_s8 }
  0x59   : > { %s287_s6 = sshll.u32 %s244_s4, 4  ;;  %v261_v2 = vmul.f32 %v259_v1, %v258_v0  ;;  %v265_v3 = vadd.f32 %v259_v1, %v258_v0  ;;  %s251_s30 = scalar_lea.vmem [#allocation8], %s444_s8  ;;  %s904_s6 = int_to_ptr.vmem [resolvable:$true] %s287_s6 }
  0x5a   : > { %s300_s7 = sshll.u32 %s251_s30, 4  ;;  %s902_s29 = scalar_lea.hbm %s982_s2, %s450_s11  ;;  %s911_s7 = int_to_ptr.vmem [resolvable:$true] %s300_s7 }
  0x5b   : > { %s909_s15 = scalar_lea.hbm %s983_s3, %s450_s11  ;;  %263 = vst [vmem:[%s244_s4] sm:$0xff] %v261_v2  ;;  %267 = vst [vmem:[%s251_s30] sm:$0xff] %v265_v3  ;;  %s269_s21 = scalar_lea.sflag [#allocation4], %s885_s23 }
  0x5c   : > { %s587_s8 = scalar_lea.vmem %s904_s6, 128  ;;  %p996_p0 = scmp.ne.s32.totalorder %s988_s25, 0 }
  0x5d   : > { %p588_p8 = scmp.ne.s32.totalorder %s904_s6, %s587_s8  ;;  %s709_s10 = smov [#allocation7]  }
  0x5e   : > { %s591_s5 = sshll.u32 %s709_s10, 4  ;;  %s592_s5 = int_to_ptr.vmem [resolvable:$false] %s591_s5 }
  0x5f   : > { %p589_p7 = pnand %p588_p8, %p996_p0  ;;  %s593_s9 = scalar_lea.vmem %s592_s5, 256 }
  0x60   : > { %p594_p10 = scmp.lt.s32.totalorder %s904_s6, %s592_s5  ;;  %p595_p12 = scmp.lt.s32.totalorder %s593_s9, %s587_s8 }
  0x61   : > { %p590_p4 = pneg %p589_p7 }
  0x62   : > { %p596_p1 = por %p595_p12, %p594_p10 }
  0x64   : > { %p597_p2 = pnand %p596_p1, %p590_p4 }
  0x66   : > { %600 = shalt.err (!%p597_p2)
}
  0x67   : > { %s601_s22 = scalar_lea.hbm %s902_s29, 128  ;;  %s605_s30 = scalar_lea.hbm %s982_s2, 256 }
  0x68   : > { %p602_p9 = scmp.ne.s32.totalorder %s902_s29, %s601_s22  ;;  %p606_p6 = scmp.lt.u32.totalorder %s902_s29, %s982_s2 }
  0x69   : > { %p607_p13 = scmp.lt.u32.totalorder %s605_s30, %s601_s22  ;;  %p609_p8 = scmp.lt.u32.totalorder %s601_s22, %s902_s29 }
  0x6a   : > { %p603_p11 = pnand %p602_p9, %p996_p0 }
  0x6b   : > { %p608_p5 = por %p607_p13, %p606_p6 }
  0x6c   : > { %p604_p3 = pneg %p603_p11 }
  0x6d   : > { %p610_p7 = por %p609_p8, %p608_p5 }
  0x6f   : > { %p611_p4 = pnand %p610_p7, %p604_p3 }
  0x71   : > { %614 = shalt.err (!%p611_p4)
}
  0x72   : > { %458 = dma.vmem_to_hbm [thread:$0]  (%p996_p0), %s904_s6, 128, %s902_s29, %s269_s21  }
  0x73   : > { %s274_s24 = scalar_lea.sflag [#allocation9], %s885_s23  ;;  %s615_s19 = scalar_lea.vmem %s911_s7, 128 }
  0x74   : > { %p616_p10 = scmp.ne.s32.totalorder %s911_s7, %s615_s19  ;;  %s710_s8 = smov [#allocation8]  }
  0x75   : > { %s619_s10 = sshll.u32 %s710_s8, 4  ;;  %s620_s10 = int_to_ptr.vmem [resolvable:$false] %s619_s10 }
  0x76   : > { %p617_p12 = pnand %p616_p10, %p996_p0  ;;  %s621_s5 = scalar_lea.vmem %s620_s10, 256 }
  0x77   : > { %p622_p2 = scmp.lt.s32.totalorder %s911_s7, %s620_s10  ;;  %p623_p9 = scmp.lt.s32.totalorder %s621_s5, %s615_s19 }
  0x78   : > { %p618_p1 = pneg %p617_p12 }
  0x79   : > { %p624_p11 = por %p623_p9, %p622_p2 }
  0x7b   : > { %p625_p3 = pnand %p624_p11, %p618_p1 }
  0x7d   : > { %628 = shalt.err (!%p625_p3)
}
  0x7e   : > { %s629_s23 = scalar_lea.hbm %s909_s15, 128  ;;  %s633_s21 = scalar_lea.hbm %s983_s3, 256 }
  0x7f   : > { %p630_p6 = scmp.ne.s32.totalorder %s909_s15, %s629_s23  ;;  %p634_p8 = scmp.lt.u32.totalorder %s909_s15, %s983_s3 }
  0x80   : > { %p635_p7 = scmp.lt.u32.totalorder %s633_s21, %s629_s23  ;;  %p637_p10 = scmp.lt.u32.totalorder %s629_s23, %s909_s15 }
  0x81   : > { %p631_p13 = pnand %p630_p6, %p996_p0 }
  0x82   : > { %p636_p4 = por %p635_p7, %p634_p8 }
  0x83   : > { %p632_p5 = pneg %p631_p13 }
  0x84   : > { %p638_p12 = por %p637_p10, %p636_p4 }
  0x86   : > { %p639_p1 = pnand %p638_p12, %p632_p5 }
  0x88   : > { %642 = shalt.err (!%p639_p1)
}
  0x89   : > { %459 = dma.vmem_to_hbm [thread:$0]  (%p996_p0), %s911_s7, 128, %s909_s15, %s274_s24  }
  0x8a PF: > { %s312_s11 = sand.u32 1, %s685_s12   ;;  %p997_p2 = scmp.ne.s32.totalorder %s989_s27, 0 }
  0x8b   : > { %p998_p9 = scmp.ge.s32.totalorder %s705_s17, 2  ;;  %s313_s4 = scalar_lea.sflag [#allocation4], %s312_s11 }
  0x8d   : > { %p470_p11 = pnand %p998_p9, %p997_p2 }
  0x8f   : > { %676 = dma.done.wait (!%p470_p11), %s313_s4, 128  }
  0x90   : > { %678 = vsyncadd (!%p470_p11), %s313_s4, 4294967168  ;;  %s322_s30 = scalar_lea.sflag [#allocation9], %s312_s11 }
  0x91   : > { %680 = dma.done.wait (!%p470_p11), %s322_s30, 128  }
  0x92   : > { %682 = vsyncadd (!%p470_p11), %s322_s30, 4294967168  ;;  %s26_s17 = sadd.s32 1, %s705_s17   ;;  %s999_s12 = smov %s689_s13 }
  0x93   : > { %p23_p3 = scmp.ge.s32.totalorder %s26_s17, 4   ;;  %s1000_s13 = smov %s693_s14 }
  0x94   : > { %s1001_s14 = smov %s787_s26  ;;  %s1002_s15 = smov %s701_s16 }
  0x95   : > { %s1003_s16 = smov %s1005_s20  ;;  %25 = sbr.rel (!%p23_p3) target bundleno = 10 (0xa), region = 107 }
  0x9c   :  { %327 = vsyncpa [#allocation3], 1 }
  0x9d   :  { %329 = vsyncpa [#allocation3 + $0x1], 1 }
  0x9e   :  { %330 = vsyncpa [#allocation6], 1 }
  0x9f   :  { %332 = vsyncpa [#allocation6 + $0x1], 1 }
  0xa0   :  { %333 = vsyncpa [#allocation4], 1 }
  0xa1   :  { %335 = vsyncpa [#allocation4 + $0x1], 1 }
  0xa2   :  { %336 = vsyncpa [#allocation9], 1 }
  0xa3   :  { %338 = vsyncpa [#allocation9 + $0x1], 1 }

</bundles_post_ra>
